<compile_context>
chip_gen: v7x
topology: tpu7x:2x2x1
jax: 0.10.0
libtpu: 0.0.40
codegen_flags: <defaults>
</compile_context>

<pallas_src>
import jax
import jax.numpy as jnp
from jax.experimental import pallas as pl
from jax.experimental.pallas import tpu as pltpu

CLAMP_RATIOMIN = 1e-8
CLAMP_RATIOMAX = 1e8
H_DIM = 32
MAX_BATCH_TILE = 8192  # upper bound on rows per grid step (multiple of 128)


def _round_up(x, m):
    return ((x + m - 1) // m) * m


def _softplus(y):
    # Numerically stable softplus (one exp + one log on the EUP per vreg).
    return jnp.maximum(y, 0.0) + jnp.log1p(jnp.exp(-jnp.abs(y)))


def _ratio_kernel(x_ref, w1_ref, b1_ref, w2_ref, b2_ref, w3_ref, b3_ref,
                  w4_ref, b4_ref, o_ref):
    # x block: (tb, in_dim) f32.  Contract the feature axis of both operands
    # so the layer-1 output is already (32, tb) with batch on the lane axis.
    x = x_ref[...].astype(jnp.bfloat16)
    h = jax.lax.dot_general(
        w1_ref[...], x, (((1,), (1,)), ((), ())),
        preferred_element_type=jnp.float32) + b1_ref[...]
    h = jnp.tanh(h)
    h = jnp.tanh(jnp.dot(w2_ref[...], h.astype(jnp.bfloat16),
                         preferred_element_type=jnp.float32) + b2_ref[...])
    h = jnp.tanh(jnp.dot(w3_ref[...], h.astype(jnp.bfloat16),
                         preferred_element_type=jnp.float32) + b3_ref[...])
    y = jnp.dot(w4_ref[...], h.astype(jnp.bfloat16),
                preferred_element_type=jnp.float32) + b4_ref[...]   # (1, tb)
    o_ref[...] = jnp.clip(_softplus(y), CLAMP_RATIOMIN, CLAMP_RATIOMAX)


def ratio_forward(sazg, params, *, batch_tile=None):
    """sazg: (B, s+a+2z) float32 -> (B, 1) float32."""
    w1, b1, w2, b2, w3, b3, w4, b4 = params
    B, in_dim = sazg.shape

    if batch_tile is None:
        # Large B: big tiles amortize the ~0.35us/step overhead and the
        # per-step MXU weight pushes (VMEM footprint stays in the low MB even
        # on v7x's 64 MiB).  Small B: make sure a 2-TC v7x still gets several
        # steps per core so the BlockSpec pipeline overlaps DMA with compute.
        batch_tile = min(MAX_BATCH_TILE, max(128, _round_up(pl.cdiv(B, 6), 128)))
    tb = batch_tile
    grid = (pl.cdiv(B, tb),)   # ragged last tile is fine: padded columns are
                               # never written back to the (1, B) output.

    # One-time cast of the tiny weight matrices to bf16 (MXU-native on all
    # three generations); biases stay f32 and are added post-accumulation.
    w1b, w2b, w3b, w4b = (w.astype(jnp.bfloat16) for w in (w1, w2, w3, w4))

    out_t = pl.pallas_call(
        _ratio_kernel,
        out_shape=jax.ShapeDtypeStruct((1, B), jnp.float32),
        grid=grid,
        in_specs=[
            # Activations: pipelined over the batch grid, fed untransposed.
            pl.BlockSpec((tb, in_dim), lambda i: (i, 0)),
            # Weights / biases: same block every step -> VMEM-resident.
            pl.BlockSpec(w1b.shape, lambda i: (0, 0)),
            pl.BlockSpec(b1.shape, lambda i: (0, 0)),
            pl.BlockSpec(w2b.shape, lambda i: (0, 0)),
            pl.BlockSpec(b2.shape, lambda i: (0, 0)),
            pl.BlockSpec(w3b.shape, lambda i: (0, 0)),
            pl.BlockSpec(b3.shape, lambda i: (0, 0)),
            pl.BlockSpec(w4b.shape, lambda i: (0, 0)),
            pl.BlockSpec(b4.shape, lambda i: (0, 0)),
        ],
        out_specs=pl.BlockSpec((1, tb), lambda i: (0, i)),
        compiler_params=pltpu.CompilerParams(
            dimension_semantics=("parallel",)),  # shard batch tiles across TCs
    )(sazg, w1b, b1, w2b, b2, w3b, b3, w4b, b4)

    return out_t.T                                                   # (B, 1)


def init_ratio_params(key, s_dim, a_dim, z_dim, h_dim=H_DIM):
    """Deterministic init mimicking nn.Linear's uniform fan-in init.

    Weights stored as (out_features, in_features), biases as (out_features, 1).
    """
    in_dim = s_dim + a_dim + 2 * z_dim
    layer_dims = [(h_dim, in_dim), (h_dim, h_dim), (h_dim, h_dim), (1, h_dim)]
    keys = jax.random.split(key, 2 * len(layer_dims))
    params = []
    for idx, (out_d, in_d) in enumerate(layer_dims):
        bound = 1.0 / jnp.sqrt(in_d)
        w = jax.random.uniform(keys[2 * idx], (out_d, in_d), jnp.float32,
                               -bound, bound)
        b = jax.random.uniform(keys[2 * idx + 1], (out_d, 1), jnp.float32,
                               -bound, bound)
        params += [w, b]
    return tuple(params)


def ratio_reference(sazg, params):
    """Plain-JAX f32 reference of the PyTorch forward."""
    w1, b1, w2, b2, w3, b3, w4, b4 = params
    h = jnp.tanh(sazg @ w1.T + b1.T)
    h = jnp.tanh(h @ w2.T + b2.T)
    h = jnp.tanh(h @ w3.T + b3.T)
    y = h @ w4.T + b4.T
    return jnp.clip(jax.nn.softplus(y), CLAMP_RATIOMIN, CLAMP_RATIOMAX)


if __name__ == "__main__":
    s_dim, a_dim, z_dim = 4, 2, 2          # in_dim = s + a + 2*z = 10
    B = 1000                               # not a tile multiple -> ragged last tile, multi-step grid

    key = jax.random.PRNGKey(0)
    kp, kx = jax.random.split(key)
    params = init_ratio_params(kp, s_dim, a_dim, z_dim)
    sazg = jax.random.normal(kx, (B, s_dim + a_dim + 2 * z_dim), jnp.float32)

    out = jax.block_until_ready(ratio_forward(sazg, params))
    ref = ratio_reference(sazg, params)

    assert out.shape == (B, 1)
    assert bool(jnp.all(jnp.isfinite(out)))
    max_err = float(jnp.max(jnp.abs(out - ref)))
    # bf16 MXU operands (f32 accumulate) introduce ~1e-3-level error vs the
    # f32 reference, so the tolerance is relaxed from the original 1e-4.
    assert jnp.allclose(out, ref, atol=2e-2, rtol=2e-2), max_err

    print("KERNEL_OK")
</pallas_src>

<mosaic_0001>
module attributes {stable_mosaic.version = 11 : i64} {
  func.func @_ratio_kernel(%arg0: i32, %arg1: memref<256x10xf32, #tpu.memory_space<vmem>>, %arg2: memref<32x10xbf16, #tpu.memory_space<vmem>>, %arg3: memref<32x1xf32, #tpu.memory_space<vmem>>, %arg4: memref<32x32xbf16, #tpu.memory_space<vmem>>, %arg5: memref<32x1xf32, #tpu.memory_space<vmem>>, %arg6: memref<32x32xbf16, #tpu.memory_space<vmem>>, %arg7: memref<32x1xf32, #tpu.memory_space<vmem>>, %arg8: memref<1x32xbf16, #tpu.memory_space<vmem>>, %arg9: memref<1x1xf32, #tpu.memory_space<vmem>>, %arg10: memref<1x256xf32, #tpu.memory_space<vmem>>) attributes {dimension_semantics = [#tpu.dimension_semantics<parallel>], iteration_bounds = array<i64: 4>, scalar_prefetch = 0 : i64, scratch_operands = 0 : i64, tpu.core_type = #tpu.core_type<tc>, window_params = [{transform_indices = @transform_0, window_bounds = array<i64: 256, 10>}, {pipeline_mode = #tpu.pipeline_mode<synchronous>, transform_indices = @transform_1, window_bounds = array<i64: 32, 10>}, {pipeline_mode = #tpu.pipeline_mode<synchronous>, transform_indices = @transform_2, window_bounds = array<i64: 32, 1>}, {pipeline_mode = #tpu.pipeline_mode<synchronous>, transform_indices = @transform_3, window_bounds = array<i64: 32, 32>}, {pipeline_mode = #tpu.pipeline_mode<synchronous>, transform_indices = @transform_4, window_bounds = array<i64: 32, 1>}, {pipeline_mode = #tpu.pipeline_mode<synchronous>, transform_indices = @transform_5, window_bounds = array<i64: 32, 32>}, {pipeline_mode = #tpu.pipeline_mode<synchronous>, transform_indices = @transform_6, window_bounds = array<i64: 32, 1>}, {pipeline_mode = #tpu.pipeline_mode<synchronous>, transform_indices = @transform_7, window_bounds = array<i64: 1, 32>}, {pipeline_mode = #tpu.pipeline_mode<synchronous>, transform_indices = @transform_8, window_bounds = array<i64: 1, 1>}, {transform_indices = @transform_9, window_bounds = array<i64: 1, 256>}]} {
    %c0 = arith.constant 0 : index
    %c0_0 = arith.constant 0 : index
    %0 = vector.load %arg1[%c0, %c0_0] : memref<256x10xf32, #tpu.memory_space<vmem>>, vector<256x10xf32>
    %1 = arith.truncf %0 : vector<256x10xf32> to vector<256x10xbf16>
    %c0_1 = arith.constant 0 : index
    %c0_2 = arith.constant 0 : index
    %2 = vector.load %arg2[%c0_1, %c0_2] : memref<32x10xbf16, #tpu.memory_space<vmem>>, vector<32x10xbf16>
    %cst = arith.constant dense<0.000000e+00> : vector<32x256xf32>
    %3 = tpu.matmul %2, %1, %cst {dimension_numbers = #tpu.dot_dimension_numbers<[1], [1], [0], [0], [0, 0, 1, 0], [], []>} : vector<32x10xbf16>, vector<256x10xbf16>, vector<32x256xf32> -> vector<32x256xf32>
    %c0_3 = arith.constant 0 : index
    %c0_4 = arith.constant 0 : index
    %4 = vector.load %arg3[%c0_3, %c0_4] : memref<32x1xf32, #tpu.memory_space<vmem>>, vector<32x1xf32>
    %5 = vector.broadcast %4 : vector<32x1xf32> to vector<32x256xf32>
    %6 = arith.addf %3, %5 : vector<32x256xf32>
    %7 = math.tanh %6 : vector<32x256xf32>
    %c0_5 = arith.constant 0 : index
    %c0_6 = arith.constant 0 : index
    %8 = vector.load %arg4[%c0_5, %c0_6] : memref<32x32xbf16, #tpu.memory_space<vmem>>, vector<32x32xbf16>
    %9 = arith.truncf %7 : vector<32x256xf32> to vector<32x256xbf16>
    %cst_7 = arith.constant dense<0.000000e+00> : vector<32x256xf32>
    %10 = tpu.matmul %8, %9, %cst_7 {dimension_numbers = #tpu.dot_dimension_numbers<[1], [0], [0], [1], [0, 0, 1, 1], [], []>} : vector<32x32xbf16>, vector<32x256xbf16>, vector<32x256xf32> -> vector<32x256xf32>
    %c0_8 = arith.constant 0 : index
    %c0_9 = arith.constant 0 : index
    %11 = vector.load %arg5[%c0_8, %c0_9] : memref<32x1xf32, #tpu.memory_space<vmem>>, vector<32x1xf32>
    %12 = vector.broadcast %11 : vector<32x1xf32> to vector<32x256xf32>
    %13 = arith.addf %10, %12 : vector<32x256xf32>
    %14 = math.tanh %13 : vector<32x256xf32>
    %c0_10 = arith.constant 0 : index
    %c0_11 = arith.constant 0 : index
    %15 = vector.load %arg6[%c0_10, %c0_11] : memref<32x32xbf16, #tpu.memory_space<vmem>>, vector<32x32xbf16>
    %16 = arith.truncf %14 : vector<32x256xf32> to vector<32x256xbf16>
    %cst_12 = arith.constant dense<0.000000e+00> : vector<32x256xf32>
    %17 = tpu.matmul %15, %16, %cst_12 {dimension_numbers = #tpu.dot_dimension_numbers<[1], [0], [0], [1], [0, 0, 1, 1], [], []>} : vector<32x32xbf16>, vector<32x256xbf16>, vector<32x256xf32> -> vector<32x256xf32>
    %c0_13 = arith.constant 0 : index
    %c0_14 = arith.constant 0 : index
    %18 = vector.load %arg7[%c0_13, %c0_14] : memref<32x1xf32, #tpu.memory_space<vmem>>, vector<32x1xf32>
    %19 = vector.broadcast %18 : vector<32x1xf32> to vector<32x256xf32>
    %20 = arith.addf %17, %19 : vector<32x256xf32>
    %21 = math.tanh %20 : vector<32x256xf32>
    %c0_15 = arith.constant 0 : index
    %c0_16 = arith.constant 0 : index
    %22 = vector.load %arg8[%c0_15, %c0_16] : memref<1x32xbf16, #tpu.memory_space<vmem>>, vector<1x32xbf16>
    %23 = arith.truncf %21 : vector<32x256xf32> to vector<32x256xbf16>
    %cst_17 = arith.constant dense<0.000000e+00> : vector<1x256xf32>
    %24 = tpu.matmul %22, %23, %cst_17 {dimension_numbers = #tpu.dot_dimension_numbers<[1], [0], [0], [1], [0, 0, 1, 1], [], []>} : vector<1x32xbf16>, vector<32x256xbf16>, vector<1x256xf32> -> vector<1x256xf32>
    %c0_18 = arith.constant 0 : index
    %c0_19 = arith.constant 0 : index
    %25 = vector.load %arg9[%c0_18, %c0_19] : memref<1x1xf32, #tpu.memory_space<vmem>>, vector<1x1xf32>
    %26 = vector.broadcast %25 : vector<1x1xf32> to vector<1x256xf32>
    %27 = arith.addf %24, %26 : vector<1x256xf32>
    %cst_20 = arith.constant 0.000000e+00 : f32
    %28 = vector.broadcast %cst_20 : f32 to vector<1x256xf32>
    %29 = arith.maximumf %27, %28 : vector<1x256xf32>
    %30 = math.absf %27 : vector<1x256xf32>
    %cst_21 = arith.constant 0.000000e+00 : f32
    %31 = vector.broadcast %cst_21 : f32 to vector<1x256xf32>
    %32 = arith.subf %31, %30 : vector<1x256xf32>
    %33 = math.exp %32 : vector<1x256xf32>
    %34 = math.log1p %33 : vector<1x256xf32>
    %35 = arith.addf %29, %34 : vector<1x256xf32>
    %cst_22 = arith.constant 9.99999993E-9 : f32
    %cst_23 = arith.constant 1.000000e+08 : f32
    %36 = vector.broadcast %cst_22 : f32 to vector<1x256xf32>
    %37 = arith.maximumf %36, %35 : vector<1x256xf32>
    %38 = vector.broadcast %cst_23 : f32 to vector<1x256xf32>
    %39 = arith.minimumf %38, %37 : vector<1x256xf32>
    %c0_24 = arith.constant 0 : index
    %c0_25 = arith.constant 0 : index
    %40 = vector.load %arg10[%c0_24, %c0_25] : memref<1x256xf32, #tpu.memory_space<vmem>>, vector<1x256xf32>
    tpu.vector_store %arg10[%c0_24, %c0_25], %39 {strides = array<i32>} : memref<1x256xf32, #tpu.memory_space<vmem>>, vector<1x256xf32>,
    return
  }
  func.func @transform_0(%arg0: i32) -> (i32, i32) {
    %c0_i32 = arith.constant 0 : i32
    %c0_i32_0 = arith.constant 0 : i32
    return %arg0, %c0_i32 : i32, i32
  }
  func.func @transform_1(%arg0: i32) -> (i32, i32) {
    %c0_i32 = arith.constant 0 : i32
    %c0_i32_0 = arith.constant 0 : i32
    %c0_i32_1 = arith.constant 0 : i32
    return %c0_i32, %c0_i32_0 : i32, i32
  }
  func.func @transform_2(%arg0: i32) -> (i32, i32) {
    %c0_i32 = arith.constant 0 : i32
    %c0_i32_0 = arith.constant 0 : i32
    %c0_i32_1 = arith.constant 0 : i32
    return %c0_i32, %c0_i32_0 : i32, i32
  }
  func.func @transform_3(%arg0: i32) -> (i32, i32) {
    %c0_i32 = arith.constant 0 : i32
    %c0_i32_0 = arith.constant 0 : i32
    %c0_i32_1 = arith.constant 0 : i32
    return %c0_i32, %c0_i32_0 : i32, i32
  }
  func.func @transform_4(%arg0: i32) -> (i32, i32) {
    %c0_i32 = arith.constant 0 : i32
    %c0_i32_0 = arith.constant 0 : i32
    %c0_i32_1 = arith.constant 0 : i32
    return %c0_i32, %c0_i32_0 : i32, i32
  }
  func.func @transform_5(%arg0: i32) -> (i32, i32) {
    %c0_i32 = arith.constant 0 : i32
    %c0_i32_0 = arith.constant 0 : i32
    %c0_i32_1 = arith.constant 0 : i32
    return %c0_i32, %c0_i32_0 : i32, i32
  }
  func.func @transform_6(%arg0: i32) -> (i32, i32) {
    %c0_i32 = arith.constant 0 : i32
    %c0_i32_0 = arith.constant 0 : i32
    %c0_i32_1 = arith.constant 0 : i32
    return %c0_i32, %c0_i32_0 : i32, i32
  }
  func.func @transform_7(%arg0: i32) -> (i32, i32) {
    %c0_i32 = arith.constant 0 : i32
    %c0_i32_0 = arith.constant 0 : i32
    %c0_i32_1 = arith.constant 0 : i32
    return %c0_i32, %c0_i32_0 : i32, i32
  }
  func.func @transform_8(%arg0: i32) -> (i32, i32) {
    %c0_i32 = arith.constant 0 : i32
    %c0_i32_0 = arith.constant 0 : i32
    %c0_i32_1 = arith.constant 0 : i32
    return %c0_i32, %c0_i32_0 : i32, i32
  }
  func.func @transform_9(%arg0: i32) -> (i32, i32) {
    %c0_i32 = arith.constant 0 : i32
    %c0_i32_0 = arith.constant 0 : i32
    return %c0_i32, %arg0 : i32, i32
  }
}

</mosaic_0001>

<bundles_post_ra>
// kernel: tpu_custom_call.1
= control target key start
LH: loop header
LB: loop body
LE: loop exit
PB: predicated region body
PF: predicated region fallthrough
CT: control target
= control target key end

     0   :  { %s1473_s0 = inlined_call_operand.vmem [shape: f32[1000,10], index: 0, kind: input, shape index: {}]   ;;  %s1474_s1 = inlined_call_operand.vmem [shape: bf16[32,10], index: 1, kind: input, shape index: {}]   ;;  %s1475_s2 = inlined_call_operand.vmem [shape: f32[32,1], index: 2, kind: input, shape index: {}]   ;;  %s1476_s3 = inlined_call_operand.vmem [shape: bf16[32,32], index: 3, kind: input, shape index: {}]   ;;  %s1477_s4 = inlined_call_operand.vmem [shape: f32[32,1], index: 4, kind: input, shape index: {}]   ;;  %s1478_s5 = inlined_call_operand.vmem [shape: bf16[32,32], index: 5, kind: input, shape index: {}]   ;;  %s1479_s6 = inlined_call_operand.vmem [shape: f32[32,1], index: 6, kind: input, shape index: {}]   ;;  %s1480_s7 = inlined_call_operand.vmem [shape: bf16[1,32], index: 7, kind: input, shape index: {}]   ;;  %s1481_s8 = inlined_call_operand.<no memory space> [shape: f32[1,1], index: 8, kind: input, shape index: {}]   ;;  %s1482_s9 = inlined_call_operand.hbm [shape: f32[1,1000], index: 9, kind: output, shape index: {}]  }
   0x1   :  { %v14_v0 = vstv %s1481_s8 }
   0x2   :  { %15 = vst [vmem:[#allocation2] sm:$0x1] %v14_v0 }
   0x3   :  { %16 = vsyncpa [#allocation4], 0 }
   0x4   :  { %18 = vsyncpa [#allocation4 + $0x1], 0  ;;  %s1247_s11 = smov 0   ;;  %s1249_s12 = smov 0  }
   0x5   :  { %s1251_s13 = smov 0   ;;  %s1253_s14 = smov 0  }
   0x6 LB: > { %s967_s8 = sadd.s32 4294967295, %s1189_s14   ;;  %s968_s15 = sadd.s32 4294967294, %s1189_s14   ;;  %s1189_s14 = sphi %s1253_s14, %s1488_s14   ;;  %s1185_s13 = sphi %s1251_s13, %s1487_s13   ;;  %s1181_s12 = sphi %s1249_s12, %s1486_s12   ;;  %s1177_s11 = sphi %s1247_s11, %s1485_s11  }
   0x7   : > { %s1270_s16 = sadd.s32 1, %s1189_s14   ;;  %s225_s17 = sadd.s32 1, %s1185_s13 }
   0x8   : > { %s222_s18 = ssub.s32 %s1189_s14, %s1270_s16  ;;  %p235_p0 = scmp.ne.s32.totalorder %s1185_s13, %s1181_s12 }
   0x9   : > { %p223_p1 = scmp.eq.s32.totalorder %s222_s18, 0  ;;  %p236_p2 = scmp.eq.s32.totalorder %s967_s8, 3 }
   0xa   : > { %p241_p3 = scmp.ne.s32.totalorder %s1181_s12, %s1177_s11  ;;  %p242_p4 = scmp.eq.s32.totalorder %s968_s15, 3 }
   0xb   : > { %s1280_s19 = scalar_select %p223_p1, %s1185_s13, %s225_s17  }
   0xc   : > { %p1282_p5 = por %p236_p2, %p235_p0  ;;  %p1286_p6 = por %p242_p4, %p241_p3 }
   0xd   : > { %p971_p7 = scmp.ge.s32.totalorder %s1189_s14, 1  ;;  %p301_p8 = scmp.lt.s32.totalorder %s1189_s14, 5 }
   0xf   : > { %p302_p9 = pnand %p971_p7, %p301_p8 }
  0x10   : > { %s1292_s22 = sshll.u32 (!%p302_p9), %s967_s8, 5  ;;  %v1298_v1 = vld [vmem:[%s1474_s1] sm:$0xff] (!%p302_p9)   ;;  %vm443_vm0 = vcmask (!%p302_p9), 80896   ;;  %v1191_v3 = vmov (!%p302_p9), 0   ;;  %v411_v4 = vld [vmem:[%s1475_s2 + $0x10] sm:$0xff] (!%p302_p9)  ;;  %v410_v5 = vld [vmem:[%s1475_s2 + $0x8] sm:$0xff] (!%p302_p9) }
  0x11   : > { %305 = sbr.rel (%p302_p9) target bundleno = 1096 (0x448), region = 56  ;;  %p346_p10 = scmp.lt.s32.totalorder (!%p302_p9), %s1292_s22, 124  ;;  %v409_v2 = vld [vmem:[%s1475_s2] sm:$0xff] (!%p302_p9)  ;;  %1010 = vmatprep.mubr.msk.bf16.mxu0 (!%p302_p9), %vm443_vm0, %v1298_v1  ;;  %1063 = vset.pattern.permute.xlu0 (!%p302_p9), %v1191_v3  ;;  %v412_v6 = vld [vmem:[%s1475_s2 + $0x18] sm:$0xff] (!%p302_p9)  ;;  %v568_v19 = vld [vmem:[%s1477_s4 + $0x8] sm:$0xff] (!%p302_p9)  ;;  %vm601_vm1 = vcmask (!%p302_p9), 261120  }
  0x12   : > { %415 = vperm.xlu0 (!%p302_p9), %1063, %v409_v2   ;;  %1064 = vset.pattern.permute.xlu1 (!%p302_p9), %v1191_v3  ;;  %v567_v16 = vld [vmem:[%s1477_s4] sm:$0xff] (!%p302_p9)  ;;  %v569_v22 = vld [vmem:[%s1477_s4 + $0x10] sm:$0xff] (!%p302_p9)  ;;  %v570_v25 = vld [vmem:[%s1477_s4 + $0x18] sm:$0xff] (!%p302_p9)  ;;  %s338_s28 = sand.u32 (!%p302_p9), 1, %s1181_s12   ;;  %s1431_s15 = scalar_lea.hbm (!%p302_p9), %s1482_s9, %s1292_s22 }
  0x13   : > { %425 = vperm.xlu1 (!%p302_p9), %1064, %v411_v4   ;;  %640 = vmatprep.mubr.bf16.mxu1 (!%p302_p9), %v1191_v3  ;;  %v677_v26 = vld [vmem:[%s1479_s6] sm:$0xff] (!%p302_p9)  ;;  %v678_v27 = vld [vmem:[%s1479_s6 + $0x8] sm:$0xff] (!%p302_p9)  ;;  %v679_v33 = vld [vmem:[%s1479_s6 + $0x10] sm:$0xff] (!%p302_p9)  ;;  %s972_s29 = sshll.u32 (!%p302_p9), %s338_s28, 1  ;;  %s895_s17 = scalar_lea.sflag (!%p302_p9), [#allocation4], %s338_s28 }
  0x14   : > { %v680_v36 = vld [vmem:[%s1479_s6 + $0x18] sm:$0xff] (!%p302_p9)  ;;  %v783_v39 = vld [vmem:[#allocation2] sm:$0x1] (!%p302_p9)  ;;  %s1193_s24 = smov (!%p302_p9), [#allocation3]  }
  0x15   : > { %s1131_s25 = sshll.u32 (!%p302_p9), %s1193_s24, 4  ;;  %s1132_s25 = int_to_ptr.vmem [resolvable:$false] %s1131_s25 }
  0x16   : > { %420 = vperm.xlu0 (!%p302_p9), %1063, %v410_v5   ;;  %s1133_s26 = scalar_lea.vmem (!%p302_p9), %s1132_s25, 64 }
  0x17   : > { %430 = vperm.xlu1 (!%p302_p9), %1064, %v412_v6  }
  0x18   : > { %s347_s27 = scalar_select %p346_p10, %s1292_s22, 124 }
  0x1a   : > { %s974_s30 = sshll.u32 %s347_s27, 3  ;;  %573 = vperm.xlu0 %1063, %v567_v16  }
  0x1b   : > { %s1318_s18 = scalar_lea.vmem %s1473_s0, %s974_s30  ;;  %578 = vperm.xlu1 %1064, %v568_v19   ;;  %s340_s30 = scalar_lea.vmem [#allocation3], %s972_s29 }
  0x1c   : > { %v373_v7 = vld [vmem:[%s1318_s18 + $0x80] sm:$0xff]  ;;  %v374_v8 = vld [vmem:[%s1318_s18 + $0x88] sm:$0xff]  ;;  %v375_v12 = vld [vmem:[%s1318_s18 + $0x90] sm:$0xff] }
  0x1d   : > { %v357_v9 = vld [vmem:[%s1318_s18] sm:$0xff]  ;;  %v397_v10 = vpack.c.bf16 %v374_v8, %v373_v7  ;;  %v358_v11 = vld [vmem:[%s1318_s18 + $0x8] sm:$0xff]  ;;  %v376_v13 = vld [vmem:[%s1318_s18 + $0x98] sm:$0xff] }
  0x1e   : > { %v389_v14 = vpack.c.bf16 %v358_v11, %v357_v9  ;;  %v398_v15 = vpack.c.bf16 %v376_v13, %v375_v12  ;;  %v359_v17 = vld [vmem:[%s1318_s18 + $0x10] sm:$0xff]  ;;  %v360_v18 = vld [vmem:[%s1318_s18 + $0x18] sm:$0xff]  ;;  %v377_v23 = vld [vmem:[%s1318_s18 + $0xa0] sm:$0xff]  ;;  %583 = vperm.xlu0 %1063, %v569_v22  }
  0x1f   : > { %1014 = vmatprep.subr.msk.bf16.mxu0 %vm443_vm0, %v397_v10  ;;  %v390_v21 = vpack.c.bf16 %v360_v18, %v359_v17  ;;  %v378_v24 = vld [vmem:[%s1318_s18 + $0xa8] sm:$0xff]  ;;  %v361_v30 = vld [vmem:[%s1318_s18 + $0x20] sm:$0xff]  ;;  %588 = vperm.xlu1 %1064, %v570_v25   ;;  %v379_v34 = vld [vmem:[%s1318_s18 + $0xb0] sm:$0xff] }
  0x20   : > { %v451_v20 = vsel %vm443_vm0, %v389_v14, 0  ;;  %v399_v29 = vpack.c.bf16 %v378_v24, %v377_v23  ;;  %v362_v31 = vld [vmem:[%s1318_s18 + $0x28] sm:$0xff]  ;;  %v380_v35 = vld [vmem:[%s1318_s18 + $0xb8] sm:$0xff]  ;;  %v363_v40 = vld [vmem:[%s1318_s18 + $0x30] sm:$0xff] }
  0x21   : > { %995 = vmatpush3.bf16.xpose.msra.mxu0 %v451_v20  ;;  %v454_v28 = vsel %vm443_vm0, %v390_v21, 0  ;;  %v391_v32 = vpack.c.bf16 %v362_v31, %v361_v30  ;;  %v400_v38 = vpack.c.bf16 %v380_v35, %v379_v34  ;;  %v364_v41 = vld [vmem:[%s1318_s18 + $0x38] sm:$0xff]  ;;  %v381_v43 = vld [vmem:[%s1318_s18 + $0xc0] sm:$0xff]  ;;  %v382_v44 = vld [vmem:[%s1318_s18 + $0xc8] sm:$0xff] }
  0x22   : > { %1015 = vmatprep.subr.msk.bf16.mxu0 %vm443_vm0, %v398_v15  ;;  %683 = vperm.xlu0 %1063, %v677_v26   ;;  %v392_v42 = vpack.c.bf16 %v364_v41, %v363_v40  ;;  %v401_v46 = vpack.c.bf16 %v382_v44, %v381_v43  ;;  %v365_v47 = vld [vmem:[%s1318_s18 + $0x40] sm:$0xff]  ;;  %v366_v48 = vld [vmem:[%s1318_s18 + $0x48] sm:$0xff]  ;;  %v383_v50 = vld [vmem:[%s1318_s18 + $0xd0] sm:$0xff] }
  0x23   : > { %688 = vperm.xlu1 %1064, %v678_v27   ;;  %v457_v37 = vsel %vm443_vm0, %v391_v32, 0  ;;  %v393_v49 = vpack.c.bf16 %v366_v48, %v365_v47  ;;  %v384_v51 = vld [vmem:[%s1318_s18 + $0xd8] sm:$0xff]  ;;  %v367_v54 = vld [vmem:[%s1318_s18 + $0x50] sm:$0xff]  ;;  %v385_v57 = vld [vmem:[%s1318_s18 + $0xe0] sm:$0xff] }
  0x24   : > { %v460_v45 = vsel %vm443_vm0, %v392_v42, 0  ;;  %v402_v53 = vpack.c.bf16 %v384_v51, %v383_v50  ;;  %v368_v55 = vld [vmem:[%s1318_s18 + $0x58] sm:$0xff]  ;;  %v386_v58 = vld [vmem:[%s1318_s18 + $0xe8] sm:$0xff]  ;;  %v369_v61 = vld [vmem:[%s1318_s18 + $0x60] sm:$0xff] }
  0x25   : > { %v463_v52 = vsel %vm443_vm0, %v393_v49, 0  ;;  %v394_v56 = vpack.c.bf16 %v368_v55, %v367_v54  ;;  %v403_v60 = vpack.c.bf16 %v386_v58, %v385_v57  ;;  %v370_v62 = vld [vmem:[%s1318_s18 + $0x68] sm:$0xff]  ;;  %v387_v0 = vld [vmem:[%s1318_s18 + $0xf0] sm:$0xff]  ;;  %v388_v2 = vld [vmem:[%s1318_s18 + $0xf8] sm:$0xff] }
  0x26   : > { %693 = vperm.xlu0 %1063, %v679_v33   ;;  %v395_v63 = vpack.c.bf16 %v370_v62, %v369_v61  ;;  %v404_v5 = vpack.c.bf16 %v388_v2, %v387_v0  ;;  %v371_v6 = vld [vmem:[%s1318_s18 + $0x70] sm:$0xff]  ;;  %v372_v7 = vld [vmem:[%s1318_s18 + $0x78] sm:$0xff]  ;;  %v1066_v10 = vld [vmem:[%s1474_s1 + $0x8] sm:$0xff]   ;;  %s909_s18 = sshll.u32 %s340_s30, 4  ;;  %s1433_s18 = int_to_ptr.vmem [resolvable:$true] %s909_s18 }
  0x27   : > { %698 = vperm.xlu1 %1064, %v680_v36   ;;  %v466_v59 = vsel %vm443_vm0, %v394_v56, 0  ;;  %v396_v8 = vpack.c.bf16 %v372_v7, %v371_v6  ;;  %v1067_v42 = vld [vmem:[%s1476_s3] sm:$0xff]   ;;  %v1068_v43 = vld [vmem:[%s1476_s3 + $0x8] sm:$0xff]   ;;  %s1127_s23 = scalar_lea.vmem %s1433_s18, 32  ;;  %p1134_p0 = scmp.lt.s32.totalorder %s1433_s18, %s1132_s25 }
  0x28   : > { %v469_v4 = vsel %vm443_vm0, %v395_v63, 0  ;;  %p1128_p11 = scmp.ne.s32.totalorder %s1433_s18, %s1127_s23  ;;  %p1135_p1 = scmp.lt.s32.totalorder %s1133_s26, %s1127_s23 }
  0x29   : > { %997 = vmatpush3.bf16.xpose.msra.mxu0 %v454_v28  ;;  %v472_v9 = vsel %vm443_vm0, %v396_v8, 0 }
  0x2a   : > { %1016 = vmatprep.subr.msk.bf16.mxu0 %vm443_vm0, %v399_v29  ;;  %786 = vperm.xlu0 %1063, %v783_v39   ;;  %p1129_p12 = pnand %p1128_p11, %p1282_p5  ;;  %p1136_p2 = por %p1135_p1, %p1134_p0 }
  0x2c   : > { %p1130_p13 = pneg %p1129_p12 }
  0x2e   : > { %p1137_p3 = pnand %p1136_p2, %p1130_p13 }
  0x31   : > { %999 = vmatpush3.bf16.xpose.msra.mxu0 %v457_v37 }
  0x32   : > { %1017 = vmatprep.subr.msk.bf16.mxu0 %vm443_vm0, %v400_v38 }
  0x39   : > { %1001 = vmatpush3.bf16.xpose.msra.mxu0 %v460_v45 }
  0x3a   : > { %1018 = vmatprep.subr.msk.bf16.mxu0 %vm443_vm0, %v401_v46 }
  0x41   : > { %1003 = vmatpush3.bf16.xpose.msra.mxu0 %v463_v52 }
  0x42   : > { %1019 = vmatprep.subr.msk.bf16.mxu0 %vm443_vm0, %v402_v53 }
  0x49   : > { %1005 = vmatpush3.bf16.xpose.msra.mxu0 %v466_v59 }
  0x4a   : > { %1020 = vmatprep.subr.msk.bf16.mxu0 %vm443_vm0, %v403_v60 }
  0x51   : > { %1007 = vmatpush3.bf16.xpose.msra.mxu0 %v469_v4 }
  0x52   : > { %1021 = vmatprep.subr.msk.bf16.mxu0 %vm443_vm0, %v404_v5 }
  0x59   : > { %1009 = vmatpush3.bf16.xpose.msra.mxu0 %v472_v9 }
  0x60   : > { %1011 = vmatmul.mubr.msk.bf16.vlgmr.msra.gmra.mrb[0].mxu0 %vm443_vm0, %v1298_v1 }
  0x61   : > { %1012 = vmatprep.mubr.msk.bf16.mxu0 %vm443_vm0, %v1066_v10 }
  0x68   : > { %1013 = vmatmul.mubr.msk.bf16.gmra.mrb[4].mxu0 %vm443_vm0, %v1066_v10 }
  0x91   : > { %v416_v11 = vpop.permute.xlu0 %415 }
  0x92   : > { %v426_v20 = vpop.permute.xlu1 %425 }
  0x95   : > { %v421_v15 = vpop.permute.xlu0 %420 }
  0x96   : > { %v431_v24 = vpop.permute.xlu1 %430 }
  0x99   : > { %v574_v44 = vpop.permute.xlu0 %573 }
  0x9a   : > { %v579_v48 = vpop.permute.xlu1 %578 }
  0x9d   : > { %v584_v54 = vpop.permute.xlu0 %583 }
  0x9e   : > { %v589_v58 = vpop.permute.xlu1 %588 }
 0x133   : > { %v532_v12 = vpop.f32.mrb[0].mxu0 }
 0x134   : > { %v533_v13 = vadd.f32 %v532_v12, %v416_v11  ;;  %v534_v14 = vpop.f32.mrb[1].mxu0 }
 0x135   : > { %v535_v16 = vadd.f32 %v534_v14, %v416_v11  ;;  %v536_v17 = vpop.f32.mrb[2].mxu0  ;;  %v1069_v14 = vld [vmem:[%s1478_s5] sm:$0xff]  }
 0x136   : > { %1071 = vtanh.f32 %v533_v13  ;;  %v537_v18 = vadd.f32 %v536_v17, %v421_v15  ;;  %v538_v19 = vpop.f32.mrb[3].mxu0 }
 0x137   : > { %1073 = vtanh.f32 %v535_v16  ;;  %v539_v21 = vadd.f32 %v538_v19, %v421_v15  ;;  %v1070_v15 = vld [vmem:[%s1478_s5 + $0x8] sm:$0xff]   ;;  %v684_v16 = vpop.permute.xlu0 %683 }
 0x138   : > { %1075 = vtanh.f32 %v537_v18 }
 0x139   : > { %1077 = vtanh.f32 %v539_v21 }
 0x13b   : > { %v542_v1 = vpop.f32.mrb[4].mxu0 }
 0x13c   : > { %v543_v22 = vadd.f32 %v542_v1, %v426_v20  ;;  %v544_v23 = vpop.f32.mrb[5].mxu0 }
 0x13d   : > { %v545_v25 = vadd.f32 %v544_v23, %v426_v20  ;;  %v546_v26 = vpop.f32.mrb[6].mxu0  ;;  %v689_v20 = vpop.permute.xlu1 %688 }
 0x13e   : > { %1079 = vtanh.f32 %v543_v22  ;;  %v547_v27 = vadd.f32 %v546_v26, %v431_v24  ;;  %v548_v28 = vpop.f32.mrb[7].mxu0 }
 0x13f   : > { %1081 = vtanh.f32 %v545_v25  ;;  %v549_v29 = vadd.f32 %v548_v28, %v431_v24  ;;  %v694_v25 = vpop.permute.xlu0 %693 }
 0x140   : > { %v1072_v30 = vpop.eup %1071  ;;  %1083 = vtanh.f32 %v547_v27 }
 0x141   : > { %v1074_v31 = vpop.eup %1073  ;;  %1085 = vtanh.f32 %v549_v29  ;;  %v699_v29 = vpop.permute.xlu1 %698 }
 0x142   : > { %v1076_v32 = vpop.eup %1075 }
 0x143   : > { %v1078_v33 = vpop.eup %1077  ;;  %v563_v34 = vpack.c.bf16 %v1076_v32, %v1072_v30 }
 0x144   : > { %v564_v35 = vpack.c.bf16 %v1078_v33, %v1074_v31 }
 0x146   : > { %608 = vmatprep.subr.bf16.mxu1 %v564_v35 }
 0x147   : > { %609 = vmatpush1.bf16.msra.mxu1 %v563_v34 }
 0x148   : > { %v1080_v36 = vpop.eup %1079 }
 0x149   : > { %v1082_v37 = vpop.eup %1081 }
 0x14a   : > { %v1084_v38 = vpop.eup %1083 }
 0x14b   : > { %v1086_v39 = vpop.eup %1085  ;;  %v565_v40 = vpack.c.bf16 %v1084_v38, %v1080_v36 }
 0x14c   : > { %v566_v41 = vpack.c.bf16 %v1086_v39, %v1082_v37 }
 0x14e   : > { %610 = vmatprep.subr.bf16.mxu1 %v566_v41 }
 0x14f   : > { %611 = vmatpush1.bf16.msra.mxu1 %v565_v40 }
 0x152   : > { %981 = vmatmul.mubr.msk.bf16.vlgmr.msra.gmra.mrb[0].mxu1 %vm601_vm1, %v1067_v42 }
 0x153   : > { %650 = vmatprep.mubr.bf16.mxu1 %v1191_v3 }
 0x15a   : > { %982 = vmatmul.mubr.msk.bf16.gmra.mrb[4].mxu1 %vm601_vm1, %v1068_v43 }
 0x15b   : > { %749 = vmatprep.mubr.bf16.mxu1 %v1191_v3 }
 0x225   : > { %v642_v45 = vpop.f32.mrb[0].mxu1 }
 0x226   : > { %v643_v46 = vadd.f32 %v642_v45, %v574_v44  ;;  %v644_v47 = vpop.f32.mrb[1].mxu1 }
 0x227   : > { %v645_v49 = vadd.f32 %v644_v47, %v574_v44  ;;  %v646_v50 = vpop.f32.mrb[2].mxu1  ;;  %v789_v47 = vlaneseq }
 0x228   : > { %1087 = vtanh.f32 %v643_v46  ;;  %v647_v51 = vadd.f32 %v646_v50, %v579_v48  ;;  %v648_v52 = vpop.f32.mrb[3].mxu1  ;;  %v778_v46 = vld [vmem:[%s1480_s7] sm:$0x1]  ;;  %v787_v50 = vpop.permute.xlu0 %786 }
 0x229   : > { %1089 = vtanh.f32 %v645_v49  ;;  %v649_v53 = vadd.f32 %v648_v52, %v579_v48  ;;  %v790_v48 = vshrl.u32 %v789_v47, 7  ;;  %vm891_vm4 = vcmp.lt.s32.totalorder %v789_v47, 256 }
 0x22a   : > { %1091 = vtanh.f32 %v647_v51 }
 0x22b   : > { %1093 = vtanh.f32 %v649_v53  ;;  %v791_v49 = vsub.s32 0, %v790_v48 }
 0x22d   : > { %v652_v55 = vpop.f32.mrb[4].mxu1  ;;  %v792_v51 = vrot.slane %v787_v50, %v791_v49 }
 0x22e   : > { %v653_v56 = vadd.f32 %v652_v55, %v584_v54  ;;  %v654_v57 = vpop.f32.mrb[5].mxu1 }
 0x22f   : > { %v655_v59 = vadd.f32 %v654_v57, %v584_v54  ;;  %v656_v60 = vpop.f32.mrb[6].mxu1 }
 0x230   : > { %1095 = vtanh.f32 %v653_v56  ;;  %v657_v61 = vadd.f32 %v656_v60, %v589_v58  ;;  %v658_v62 = vpop.f32.mrb[7].mxu1 }
 0x231   : > { %1097 = vtanh.f32 %v655_v59  ;;  %v659_v63 = vadd.f32 %v658_v62, %v589_v58 }
 0x232   : > { %v1088_v0 = vpop.eup %1087  ;;  %1099 = vtanh.f32 %v657_v61 }
 0x233   : > { %v1090_v2 = vpop.eup %1089  ;;  %1101 = vtanh.f32 %v659_v63 }
 0x234   : > { %v1092_v4 = vpop.eup %1091 }
 0x235   : > { %v1094_v5 = vpop.eup %1093  ;;  %v673_v6 = vpack.c.bf16 %v1092_v4, %v1088_v0 }
 0x236   : > { %v674_v7 = vpack.c.bf16 %v1094_v5, %v1090_v2 }
 0x238   : > { %717 = vmatprep.subr.bf16.mxu1 %v674_v7 }
 0x239   : > { %718 = vmatpush1.bf16.msra.mxu1 %v673_v6 }
 0x23a   : > { %v1096_v8 = vpop.eup %1095 }
 0x23b   : > { %v1098_v9 = vpop.eup %1097 }
 0x23c   : > { %v1100_v10 = vpop.eup %1099 }
 0x23d   : > { %v1102_v11 = vpop.eup %1101  ;;  %v675_v12 = vpack.c.bf16 %v1100_v10, %v1096_v8 }
 0x23e   : > { %v676_v13 = vpack.c.bf16 %v1102_v11, %v1098_v9 }
 0x240   : > { %719 = vmatprep.subr.bf16.mxu1 %v676_v13 }
 0x241   : > { %720 = vmatpush1.bf16.msra.mxu1 %v675_v12 }
 0x244   : > { %985 = vmatmul.mubr.msk.bf16.vlgmr.msra.gmra.mrb[8].mxu1 %vm601_vm1, %v1069_v14  ;;  %v1192_v14 = vmov 1966171168  }
 0x245   : > { %759 = vmatprep.mubr.bf16.mxu1 %v1191_v3 }
 0x24c   : > { %986 = vmatmul.mubr.msk.bf16.gmra.mrb[12].mxu1 %vm601_vm1, %v1070_v15  ;;  %v875_v15 = vunpack.c.l.s4 %v1192_v14 }
 0x24d   : > { %828 = vmatprep.mubr.bf16.mxu1 %v1191_v3 }
 0x317   : > { %v751_v17 = vpop.f32.mrb[8].mxu1 }
 0x318   : > { %v752_v18 = vadd.f32 %v751_v17, %v684_v16  ;;  %v753_v19 = vpop.f32.mrb[9].mxu1 }
 0x319   : > { %v754_v21 = vadd.f32 %v753_v19, %v684_v16  ;;  %v755_v1 = vpop.f32.mrb[10].mxu1 }
 0x31a   : > { %1103 = vtanh.f32 %v752_v18  ;;  %v756_v22 = vadd.f32 %v755_v1, %v689_v20  ;;  %v757_v23 = vpop.f32.mrb[11].mxu1 }
 0x31b   : > { %1105 = vtanh.f32 %v754_v21  ;;  %v758_v24 = vadd.f32 %v757_v23, %v689_v20 }
 0x31c   : > { %1107 = vtanh.f32 %v756_v22 }
 0x31d   : > { %1109 = vtanh.f32 %v758_v24  ;;  %v876_v24 = vunpack.c.0.s8 %v875_v15 }
 0x31f   : > { %v761_v26 = vpop.f32.mrb[12].mxu1 }
 0x320   : > { %v762_v27 = vadd.f32 %v761_v26, %v694_v25  ;;  %v763_v28 = vpop.f32.mrb[13].mxu1 }
 0x321   : > { %v764_v3 = vadd.f32 %v763_v28, %v694_v25  ;;  %v765_v30 = vpop.f32.mrb[14].mxu1 }
 0x322   : > { %1111 = vtanh.f32 %v762_v27  ;;  %v766_v31 = vadd.f32 %v765_v30, %v699_v29  ;;  %v767_v32 = vpop.f32.mrb[15].mxu1 }
 0x323   : > { %1113 = vtanh.f32 %v764_v3  ;;  %v768_v33 = vadd.f32 %v767_v32, %v699_v29  ;;  %v879_v29 = vsub.s32 %v876_v24, %v790_v48 }
 0x324   : > { %v1104_v34 = vpop.eup %1103  ;;  %1115 = vtanh.f32 %v766_v31 }
 0x325   : > { %v1106_v35 = vpop.eup %1105  ;;  %1117 = vtanh.f32 %v768_v33 }
 0x326   : > { %v1108_v36 = vpop.eup %1107 }
 0x327   : > { %v1110_v37 = vpop.eup %1109  ;;  %v779_v38 = vpack.c.bf16 %v1108_v36, %v1104_v34 }
 0x328   : > { %v780_v39 = vpack.c.bf16 %v1110_v37, %v1106_v35 }
 0x32a   : > { %796 = vmatprep.subr.bf16.mxu1 %v780_v39 }
 0x32b   : > { %797 = vmatpush1.bf16.msra.mxu1 %v779_v38 }
 0x32c   : > { %v1112_v40 = vpop.eup %1111 }
 0x32d   : > { %v1114_v41 = vpop.eup %1113 }
 0x32e   : > { %v1116_v42 = vpop.eup %1115 }
 0x32f   : > { %v1118_v43 = vpop.eup %1117  ;;  %v781_v44 = vpack.c.bf16 %v1116_v42, %v1112_v40 }
 0x330   : > { %v782_v45 = vpack.c.bf16 %v1118_v43, %v1114_v41 }
 0x332   : > { %798 = vmatprep.subr.bf16.mxu1 %v782_v45 }
 0x333   : > { %799 = vmatpush1.bf16.msra.mxu1 %v781_v44 }
 0x336   : > { %987 = vmatmul.mubr.msk.bf16.vlgmr.msra.gmra.mrb[16].mxu1 %vm601_vm1, %v778_v46 }
 0x409   : > { %v830_v52 = vpop.f32.mrb[16].mxu1 }
 0x40a   : > { %v831_v53 = vadd.f32 %v830_v52, %v792_v51  ;;  %v832_v54 = vpop.f32.mrb[17].mxu1 }
 0x40b   : > { %v833_v55 = vadd.f32 %v832_v54, %v792_v51  ;;  %v834_v56 = vpop.f32.mrb[18].mxu1 }
 0x40c   : > { %v839_v57 = vand.u32 2147483647, %v831_v53  ;;  %v835_v58 = vpop.f32.mrb[19].mxu1  ;;  %v837_v18 = vmax.f32 %v831_v53, 0.0 }
 0x40d   : > { %v840_v59 = vand.u32 2147483647, %v833_v55  ;;  %v838_v1 = vmax.f32 %v833_v55, 0.0 }
 0x40e   : > { %v841_v60 = vsub.f32 0.0, %v839_v57 }
 0x40f   : > { %v842_v61 = vsub.f32 0.0, %v840_v59 }
 0x410   : > { %v843_v62 = vmul.f32 1.442695, %v841_v60 }
 0x411   : > { %v845_v63 = vmul.f32 1.442695, %v842_v61 }
 0x412   : > { %1119 = vpow2.f32 %v843_v62 }
 0x413   : > { %1121 = vpow2.f32 %v845_v63 }
 0x41c   : > { %v1120_v0 = vpop.eup %1119 }
 0x41d   : > { %v1122_v2 = vpop.eup %1121  ;;  %v847_v4 = vadd.f32 1.0, %v1120_v0  ;;  %v850_v6 = vmul.f32 -0.5, %v1120_v0  ;;  %v853_v9 = vand.u32 2147483647, %v1120_v0 }
 0x41e   : > { %v856_v5 = vadd.f32 1.0, %v1122_v2  ;;  %v859_v7 = vmul.f32 -0.5, %v1122_v2  ;;  %v862_v11 = vand.u32 2147483647, %v1122_v2 }
 0x41f   : > { %1123 = vlog2.f32 %v847_v4  ;;  %v851_v8 = vadd.f32 1.0, %v850_v6  ;;  %vm854_vm2 = vcmp.lt.f32.partialorder %v853_v9, 0.0004427343 }
 0x420   : > { %1125 = vlog2.f32 %v856_v5  ;;  %v860_v10 = vadd.f32 1.0, %v859_v7  ;;  %vm863_vm3 = vcmp.lt.f32.partialorder %v862_v11, 0.0004427343 }
 0x421   : > { %v852_v17 = vmul.f32 %v1120_v0, %v851_v8 }
 0x422   : > { %v861_v20 = vmul.f32 %v1122_v2, %v860_v10 }
 0x429   : > { %v1124_v12 = vpop.eup %1123 }
 0x42a   : > { %v1126_v13 = vpop.eup %1125  ;;  %v849_v16 = vmul.f32 0.6931472, %v1124_v12 }
 0x42b   : > { %v858_v19 = vmul.f32 0.6931472, %v1126_v13 }
 0x42c   : > { %v855_v21 = vsel %vm854_vm2, %v852_v17, %v849_v16 }
 0x42d   : > { %v865_v22 = vadd.f32 %v855_v21, %v837_v18  ;;  %v864_v23 = vsel %vm863_vm3, %v861_v20, %v858_v19 }
 0x42e   : > { %v866_v25 = vadd.f32 %v864_v23, %v838_v1 }
 0x42f   : > { %v867_v26 = vmax.f32 %v865_v22, 1e-08 }
 0x430   : > { %v868_v27 = vmax.f32 %v866_v25, 1e-08 }
 0x431   : > { %v869_v28 = vmin.f32 %v867_v26, 1e+08 }
 0x432   : > { %v870_v3 = vmin.f32 %v868_v27, 1e+08 }
 0x434   : > { %v873_v30 = vcombine.low %v869_v28, %v870_v3 }
 0x436   : > { %v880_v31 = vrot.slane %v873_v30, %v879_v29 }
 0x438   : > { %v887_v32 = vrot.slane %v880_v31, %v879_v29 }
 0x43a   : > { %893 = vst.msk [vmem:[%s340_s30] sm:$0x3] %vm891_vm4, %v887_v32 }
 0x43b   : > { %1140 = shalt.err (!%p1137_p3)
}
 0x43c   : > { %s1141_s22 = scalar_lea.hbm %s1431_s15, 32  ;;  %s1145_s29 = scalar_lea.hbm %s1482_s9, 128 }
 0x43d   : > { %p1142_p4 = scmp.ne.s32.totalorder %s1431_s15, %s1141_s22  ;;  %p1146_p9 = scmp.lt.u32.totalorder %s1431_s15, %s1482_s9 }
 0x43e   : > { %p1147_p10 = scmp.lt.u32.totalorder %s1145_s29, %s1141_s22  ;;  %p1149_p12 = scmp.lt.u32.totalorder %s1141_s22, %s1431_s15 }
 0x43f   : > { %p1143_p7 = pnand %p1142_p4, %p1282_p5 }
 0x440   : > { %p1148_p11 = por %p1147_p10, %p1146_p9 }
 0x441   : > { %p1144_p8 = pneg %p1143_p7 }
 0x442   : > { %p1150_p13 = por %p1149_p12, %p1148_p11 }
 0x444   : > { %p1151_p0 = pnand %p1150_p13, %p1144_p8 }
 0x446   : > { %1154 = shalt.err (!%p1151_p0)
}
 0x447   : > { %1022 = dma.vmem_to_hbm [thread:$0]  (%p1282_p5), %s1433_s18, 32, %s1431_s15, %s895_s17  }
 0x448 PF: > { %p1028_p1 = scmp.ge.s32.totalorder %s1189_s14, 2  ;;  %s921_s8 = sand.u32 1, %s1177_s11  }
 0x449   : > { %s922_s23 = scalar_lea.sflag [#allocation4], %s921_s8 }
 0x44a   : > { %p1025_p2 = pnand %p1028_p1, %p1286_p6 }
 0x44c   : > { %1172 = dma.done.wait (!%p1025_p2), %s922_s23, 32  }
 0x44d   : > { %1174 = vsyncadd (!%p1025_p2), %s922_s23, 4294967264  ;;  %p21_p3 = scmp.ge.s32.totalorder %s1270_s16, 6   ;;  %s1485_s11 = smov %s1181_s12 }
 0x44e   : > { %s1486_s12 = smov %s1185_s13  ;;  %s1487_s13 = smov %s1280_s19 }
 0x44f   : > { %s1488_s14 = smov %s1270_s16  ;;  %23 = sbr.rel (!%p21_p3) target bundleno = 6 (0x6), region = 91 }
 0x456   :  { %927 = vsyncpa [#allocation4], 1 }
 0x457   :  { %929 = vsyncpa [#allocation4 + $0x1], 1 }

</bundles_post_ra>
